<compile_context>
chip_gen: v7x
topology: tpu7x:2x2x1
jax: 0.10.0
libtpu: 0.0.40
codegen_flags: <defaults>
</compile_context>

<pallas_src>
import functools

import jax
import jax.numpy as jnp
from jax.experimental import pallas as pl
from jax.experimental.pallas import tpu as pltpu

CLAMP_MIN = 1e-40  # spec value; denormal in float32 (TPU flushes denormals to 0)
_CLAMP_SAFE = max(CLAMP_MIN, float(jnp.finfo(jnp.float32).tiny))  # ~1.18e-38
_LANE = 128
_NEG_BIG = -1e30  # bias for padded class columns -> softmax prob == 0


def _round_up(n, m):
    return ((n + m - 1) // m) * m


def prepare_ensemble_params(weights, biases, weight_dtype=jnp.bfloat16):
    """One-time parameter fusion (run OUTSIDE the hot path).

    weights: [M, D, K] float32,  biases: [M, 1, K] float32
    Returns:
      w_fused [D, M*Kp] weight_dtype, b_fused [1, M*Kp] float32, M, Kp, K
    where Kp = K rounded up to a multiple of 128 (padded bias = -1e30).
    """
    M, D, K = weights.shape
    Kp = _round_up(K, _LANE)
    if Kp != K:
        pad = Kp - K
        weights = jnp.pad(weights, ((0, 0), (0, 0), (0, pad)))
        biases = jnp.pad(biases, ((0, 0), (0, 0), (0, pad)),
                         constant_values=_NEG_BIG)
    w_fused = (jnp.transpose(weights, (1, 0, 2))
               .reshape(D, M * Kp).astype(weight_dtype))
    b_fused = biases.reshape(1, M * Kp).astype(jnp.float32)
    return w_fused, b_fused, M, Kp, K


def _ensemble_soft_kernel(x_ref, w_ref, b_ref, o_ref, *, n_models, n_classes):
    """Single-step kernel: one fused matmul over all M members, then M softmaxes.

    x_ref: (B, D)   w_ref: (D, M*Kp) bf16   b_ref: (1, M*Kp) f32   o_ref: (B, Kp)
    """
    x = x_ref[...].astype(w_ref.dtype)
    # One MXU matmul covering all ensemble members, f32 accumulation.
    logits = jnp.dot(x, w_ref[...],
                     preferred_element_type=jnp.float32) + b_ref[...]

    acc = None
    for m in range(n_models):  # static unrolled loop; lane-aligned Kp slices
        sl = logits[:, m * n_classes:(m + 1) * n_classes]
        # Numerically-stable softmax over the last (lane) axis.
        mx = jnp.max(sl, axis=-1, keepdims=True)
        e = jnp.exp(sl - mx)
        denom = jnp.sum(e, axis=-1, keepdims=True)
        p = e / denom           # exact divide; DMA-bound kernel, cost is hidden
        acc = p if acc is None else acc + p

    avg = acc * (1.0 / n_models)                 # multiply, not divide
    o_ref[...] = jnp.log(jnp.maximum(avg, _CLAMP_SAFE)).astype(o_ref.dtype)


def _single_model_kernel(x_ref, w_ref, b_ref, o_ref):
    """len(models) == 1 branch: raw logits of the single model (no softmax/log)."""
    x = x_ref[...].astype(w_ref.dtype)
    o_ref[...] = (jnp.dot(x, w_ref[...], preferred_element_type=jnp.float32)
                  + b_ref[...]).astype(o_ref.dtype)


@functools.partial(jax.jit, static_argnames=("n_models", "n_classes"))
def ensemble_soft_forward(x_nchw, w_fused, b_fused, *, n_models, n_classes):
    """x_nchw:  [B, C, H, W] float32
       w_fused: [D, M*Kp]    bfloat16 (from prepare_ensemble_params)
       b_fused: [1, M*Kp]    float32
    Returns [B, n_classes] float32 (log of averaged softmax for M>1, raw logits for M==1).
    """
    B = x_nchw.shape[0]
    D, MK = w_fused.shape
    M = n_models
    Kp = MK // M

    # Only layout-free plumbing in the hot path (reshape of a contiguous array).
    x2d = x_nchw.reshape(B, D)

    out_shape = jax.ShapeDtypeStruct((B, Kp), jnp.float32)
    vmem = pltpu.MemorySpace.VMEM

    bytes_accessed = (x2d.size * x2d.dtype.itemsize
                      + w_fused.size * w_fused.dtype.itemsize
                      + b_fused.size * b_fused.dtype.itemsize
                      + B * Kp * 4)
    cost = pl.CostEstimate(
        flops=2 * B * D * M * Kp,
        transcendentals=(B * M * Kp if M > 1 else 0),
        bytes_accessed=bytes_accessed)

    if M > 1:
        kernel = functools.partial(
            _ensemble_soft_kernel, n_models=M, n_classes=Kp)
    else:
        kernel = _single_model_kernel

    out = pl.pallas_call(
        kernel,
        out_shape=out_shape,
        in_specs=[
            pl.BlockSpec(memory_space=vmem),   # x, whole array resident in VMEM
            pl.BlockSpec(memory_space=vmem),   # fused bf16 weights
            pl.BlockSpec(memory_space=vmem),   # fused f32 biases
        ],
        out_specs=pl.BlockSpec(memory_space=vmem),
        cost_estimate=cost,
    )(x2d, w_fused, b_fused)

    if n_classes != Kp:
        out = out[:, :n_classes]   # drop padded class columns (tiny copy)
    return out


def _reference(x_nchw, w_fused, b_fused, n_models, n_classes):
    """Pure-JAX reference computing the same math on the same (bf16-quantized) params."""
    B = x_nchw.shape[0]
    D, MK = w_fused.shape
    Kp = MK // n_models
    x2d = x_nchw.reshape(B, D).astype(jnp.bfloat16).astype(jnp.float32)
    w = w_fused.astype(jnp.float32)
    logits = x2d @ w + b_fused
    if n_models == 1:
        return logits[:, :n_classes]
    probs = jnp.zeros((B, Kp), jnp.float32)
    for m in range(n_models):
        probs = probs + jax.nn.softmax(logits[:, m * Kp:(m + 1) * Kp], axis=-1)
    avg = probs / n_models
    return jnp.log(jnp.maximum(avg, _CLAMP_SAFE))[:, :n_classes]


if __name__ == "__main__":
    key = jax.random.PRNGKey(0)
    B, C, H, W = 2, 4, 16, 16      # input NCHW
    K = 128                        # number of classes (lane-aligned)
    M = 3                          # number of ensemble members
    D = C * H * W

    kx, kw, kb = jax.random.split(key, 3)
    x = jax.random.normal(kx, (B, C, H, W), dtype=jnp.float32)
    weights = jax.random.normal(kw, (M, D, K), dtype=jnp.float32) * 0.05
    biases = jax.random.normal(kb, (M, 1, K), dtype=jnp.float32) * 0.01

    # One-time parameter prep (outside the per-call hot path).
    w_fused, b_fused, M_, Kp, K_ = prepare_ensemble_params(weights, biases)

    out = ensemble_soft_forward(x, w_fused, b_fused, n_models=M_, n_classes=K_)
    out = jax.block_until_ready(out)

    ref = _reference(x, w_fused, b_fused, M_, K_)
    assert out.shape == (B, K)
    assert jnp.allclose(out, ref, atol=2e-3, rtol=2e-3), (
        float(jnp.max(jnp.abs(out - ref))))

    # Also exercise the M == 1 branch (raw logits of the single model).
    w1, b1, M1, Kp1, K1 = prepare_ensemble_params(weights[:1], biases[:1])
    out1 = jax.block_until_ready(
        ensemble_soft_forward(x, w1, b1, n_models=M1, n_classes=K1))
    ref1 = _reference(x, w1, b1, M1, K1)
    assert out1.shape == (B, K)
    assert jnp.allclose(out1, ref1, atol=2e-3, rtol=2e-3), (
        float(jnp.max(jnp.abs(out1 - ref1))))

    print("KERNEL_OK")
</pallas_src>

<mosaic_0001>
module attributes {stable_mosaic.version = 11 : i64} {
  func.func @_ensemble_soft_kernel(%arg0: memref<2x1024xf32, #tpu.memory_space<vmem>>, %arg1: memref<1024x384xbf16, #tpu.memory_space<vmem>>, %arg2: memref<1x384xf32, #tpu.memory_space<vmem>>, %arg3: memref<2x128xf32, #tpu.memory_space<vmem>>) attributes {dimension_semantics = [], scalar_prefetch = 0 : i64, scratch_operands = 0 : i64, tpu.core_type = #tpu.core_type<tc>} {
    %c0 = arith.constant 0 : index
    %c0_0 = arith.constant 0 : index
    %0 = vector.load %arg0[%c0, %c0_0] : memref<2x1024xf32, #tpu.memory_space<vmem>>, vector<2x1024xf32>
    %1 = arith.truncf %0 : vector<2x1024xf32> to vector<2x1024xbf16>
    %c0_1 = arith.constant 0 : index
    %c0_2 = arith.constant 0 : index
    %2 = vector.load %arg1[%c0_1, %c0_2] : memref<1024x384xbf16, #tpu.memory_space<vmem>>, vector<1024x384xbf16>
    %cst = arith.constant dense<0.000000e+00> : vector<2x384xf32>
    %3 = tpu.matmul %1, %2, %cst {dimension_numbers = #tpu.dot_dimension_numbers<[1], [0], [0], [1], [0, 0, 1, 1], [], []>} : vector<2x1024xbf16>, vector<1024x384xbf16>, vector<2x384xf32> -> vector<2x384xf32>
    %c0_3 = arith.constant 0 : index
    %c0_4 = arith.constant 0 : index
    %4 = vector.load %arg2[%c0_3, %c0_4] : memref<1x384xf32, #tpu.memory_space<vmem>>, vector<1x384xf32>
    %5 = vector.broadcast %4 : vector<1x384xf32> to vector<2x384xf32>
    %6 = arith.addf %3, %5 : vector<2x384xf32>
    %7 = vector.extract_strided_slice %6 {offsets = [0, 0], sizes = [2, 128], strides = [1, 1]} : vector<2x384xf32> to vector<2x128xf32>
    %cst_5 = arith.constant dense<0xFF800000> : vector<2xf32>
    %8 = vector.multi_reduction <maximumf>, %7, %cst_5 [1] : vector<2x128xf32> to vector<2xf32>
    %9 = vector.shape_cast %8 : vector<2xf32> to vector<2x1xf32>
    %10 = vector.broadcast %9 : vector<2x1xf32> to vector<2x128xf32>
    %11 = arith.subf %7, %10 : vector<2x128xf32>
    %12 = math.exp %11 : vector<2x128xf32>
    %cst_6 = arith.constant dense<0.000000e+00> : vector<2xf32>
    %13 = vector.multi_reduction <add>, %12, %cst_6 [1] : vector<2x128xf32> to vector<2xf32>
    %14 = vector.shape_cast %13 : vector<2xf32> to vector<2x1xf32>
    %15 = vector.broadcast %14 : vector<2x1xf32> to vector<2x128xf32>
    %16 = arith.divf %12, %15 : vector<2x128xf32>
    %17 = vector.extract_strided_slice %6 {offsets = [0, 128], sizes = [2, 128], strides = [1, 1]} : vector<2x384xf32> to vector<2x128xf32>
    %cst_7 = arith.constant dense<0xFF800000> : vector<2xf32>
    %18 = vector.multi_reduction <maximumf>, %17, %cst_7 [1] : vector<2x128xf32> to vector<2xf32>
    %19 = vector.shape_cast %18 : vector<2xf32> to vector<2x1xf32>
    %20 = vector.broadcast %19 : vector<2x1xf32> to vector<2x128xf32>
    %21 = arith.subf %17, %20 : vector<2x128xf32>
    %22 = math.exp %21 : vector<2x128xf32>
    %cst_8 = arith.constant dense<0.000000e+00> : vector<2xf32>
    %23 = vector.multi_reduction <add>, %22, %cst_8 [1] : vector<2x128xf32> to vector<2xf32>
    %24 = vector.shape_cast %23 : vector<2xf32> to vector<2x1xf32>
    %25 = vector.broadcast %24 : vector<2x1xf32> to vector<2x128xf32>
    %26 = arith.divf %22, %25 : vector<2x128xf32>
    %27 = arith.addf %16, %26 : vector<2x128xf32>
    %28 = vector.extract_strided_slice %6 {offsets = [0, 256], sizes = [2, 128], strides = [1, 1]} : vector<2x384xf32> to vector<2x128xf32>
    %cst_9 = arith.constant dense<0xFF800000> : vector<2xf32>
    %29 = vector.multi_reduction <maximumf>, %28, %cst_9 [1] : vector<2x128xf32> to vector<2xf32>
    %30 = vector.shape_cast %29 : vector<2xf32> to vector<2x1xf32>
    %31 = vector.broadcast %30 : vector<2x1xf32> to vector<2x128xf32>
    %32 = arith.subf %28, %31 : vector<2x128xf32>
    %33 = math.exp %32 : vector<2x128xf32>
    %cst_10 = arith.constant dense<0.000000e+00> : vector<2xf32>
    %34 = vector.multi_reduction <add>, %33, %cst_10 [1] : vector<2x128xf32> to vector<2xf32>
    %35 = vector.shape_cast %34 : vector<2xf32> to vector<2x1xf32>
    %36 = vector.broadcast %35 : vector<2x1xf32> to vector<2x128xf32>
    %37 = arith.divf %33, %36 : vector<2x128xf32>
    %38 = arith.addf %27, %37 : vector<2x128xf32>
    %cst_11 = arith.constant 0.333333343 : f32
    %39 = vector.broadcast %cst_11 : f32 to vector<2x128xf32>
    %40 = arith.mulf %38, %39 : vector<2x128xf32>
    %cst_12 = arith.constant 1.17549435E-38 : f32
    %41 = vector.broadcast %cst_12 : f32 to vector<2x128xf32>
    %42 = arith.maximumf %40, %41 : vector<2x128xf32>
    %43 = math.log %42 : vector<2x128xf32>
    %c0_13 = arith.constant 0 : index
    %c0_14 = arith.constant 0 : index
    %44 = vector.load %arg3[%c0_13, %c0_14] : memref<2x128xf32, #tpu.memory_space<vmem>>, vector<2x128xf32>
    tpu.vector_store %arg3[%c0_13, %c0_14], %43 {strides = array<i32>} : memref<2x128xf32, #tpu.memory_space<vmem>>, vector<2x128xf32>,
    return
  }
}

</mosaic_0001>

<bundles_post_ra>
// kernel: ensemble_soft_forward.1
= control target key start
LH: loop header
LB: loop body
LE: loop exit
PB: predicated region body
PF: predicated region fallthrough
CT: control target
= control target key end

     0   :  { %8 = vsyncpa [#allocation3], 0  ;;  %s2490_s0 = inlined_call_operand.vmem [shape: f32[2,1024], index: 0, kind: input, shape index: {}]   ;;  %s2491_s1 = inlined_call_operand.hbm [shape: bf16[1024,384], index: 1, kind: input, shape index: {}]   ;;  %s2492_s2 = inlined_call_operand.vmem [shape: f32[1,384], index: 2, kind: input, shape index: {}]   ;;  %s2493_s3 = inlined_call_operand.hbm [shape: f32[2,128], index: 3, kind: output, shape index: {}]  }
   0x1   :  { %9 = vsyncpa [#allocation4], 0  ;;  %s2378_s12 = smov [#allocation2]   ;;  %s2330_s16 = scalar_lea.hbm %s2491_s1, 24576 }
   0x2   :  { %s17_s13 = sshll.u32 %s2378_s12, 4  ;;  %p2331_p0 = scmp.ne.s32.totalorder %s2491_s1, %s2330_s16  ;;  %s18_s13 = int_to_ptr.vmem [resolvable:$true] %s17_s13 }
   0x3   :  { %p2334_p1 = scmp.lt.u32.totalorder %s2330_s16, %s2491_s1 }
   0x5   :  { %p2336_p2 = pnand %p2334_p1, %p2331_p0 }
   0x7   :  { %2339 = shalt.err (!%p2336_p2)
}
   0x8   :  { %s2340_s21 = scalar_lea.vmem %s18_s13, 24576  ;;  %p2345_p4 = scmp.lt.s32.totalorder %s18_s13, %s18_s13 }
   0x9   :  { %p2341_p3 = scmp.ne.s32.totalorder %s18_s13, %s2340_s21  ;;  %p2346_p5 = scmp.lt.s32.totalorder %s2340_s21, %s2340_s21 }
   0xb   :  { %p2347_p6 = por %p2346_p5, %p2345_p4 }
   0xd   :  { %p2348_p7 = pnand %p2347_p6, %p2341_p3 }
   0xf   :  { %2351 = shalt.err (!%p2348_p7)
}
  0x10   :  { %s2379_s22 = smov 192   ;;  %s2380_s23 = smov 12  }
  0x11   :  { %23 = dma.hbm_to_vmem [thread:$0]  %s2491_s1, 24576, %s18_s13, [#allocation3], %s2379_s22, %s2379_s22, %s2380_s23  }
  0x12   :  { %2374 = dma.done.wait [#allocation3], 24576  }
  0x13   :  { %2375 = vsyncadd [#allocation3], 4294942720  ;;  %v2058_v0 = vld [vmem:[#allocation2 + $0x4] ss:$12 sps:$4 sm:$0xff]   ;;  %v2062_v2 = vld [vmem:[#allocation2] ss:$12 sps:$4 sm:$0xff]   ;;  %v38_v38 = vlaneseq }
  0x14   :  { %v2060_v1 = vld [vmem:[#allocation2 + $0x184] ss:$12 sps:$4 sm:$0xff]   ;;  %1381 = vmatprep.subr.bf16.mxu1 %v2058_v0  ;;  %v2063_v3 = vld [vmem:[#allocation2 + $0x180] ss:$12 sps:$4 sm:$0xff]   ;;  %v2064_v4 = vld [vmem:[#allocation2 + $0x1c] ss:$12 sps:$4 sm:$0xff]  }
  0x15   :  { %1422 = vmatprep.subr.bf16.mxu0 %v2060_v1  ;;  %1382 = vmatpush1.bf16.msra.mxu1 %v2062_v2  ;;  %v2066_v5 = vld [vmem:[#allocation2 + $0x19c] ss:$12 sps:$4 sm:$0xff]   ;;  %v2068_v6 = vld [vmem:[#allocation2 + $0x18] ss:$12 sps:$4 sm:$0xff]   ;;  %v2070_v8 = vld [vmem:[#allocation2 + $0x34] ss:$12 sps:$4 sm:$0xff]  }
  0x16   :  { %1423 = vmatpush1.bf16.msra.mxu0 %v2063_v3  ;;  %1383 = vmatprep.subr.bf16.mxu1 %v2064_v4  ;;  %v2069_v7 = vld [vmem:[#allocation2 + $0x198] ss:$12 sps:$4 sm:$0xff]   ;;  %v2072_v9 = vld [vmem:[#allocation2 + $0x1b4] ss:$12 sps:$4 sm:$0xff]   ;;  %v2074_v10 = vld [vmem:[#allocation2 + $0x30] ss:$12 sps:$4 sm:$0xff]  }
  0x17   :  { %1424 = vmatprep.subr.bf16.mxu0 %v2066_v5  ;;  %v2075_v11 = vld [vmem:[#allocation2 + $0x1b0] ss:$12 sps:$4 sm:$0xff]   ;;  %v2076_v12 = vld [vmem:[#allocation2 + $0x4c] ss:$12 sps:$4 sm:$0xff]   ;;  %v2080_v14 = vld [vmem:[#allocation2 + $0x48] ss:$12 sps:$4 sm:$0xff]  }
  0x18   :  { %v2078_v13 = vld [vmem:[#allocation2 + $0x1cc] ss:$12 sps:$4 sm:$0xff]   ;;  %v2081_v15 = vld [vmem:[#allocation2 + $0x1c8] ss:$12 sps:$4 sm:$0xff]   ;;  %v2082_v16 = vld [vmem:[#allocation2 + $0x64] ss:$12 sps:$4 sm:$0xff]  }
  0x19   :  { %1384 = vmatpush1.bf16.msra.mxu1 %v2068_v6  ;;  %v2084_v17 = vld [vmem:[#allocation2 + $0x1e4] ss:$12 sps:$4 sm:$0xff]   ;;  %v2086_v18 = vld [vmem:[#allocation2 + $0x60] ss:$12 sps:$4 sm:$0xff]   ;;  %v2088_v20 = vld [vmem:[#allocation2 + $0x7c] ss:$12 sps:$4 sm:$0xff]  }
  0x1a   :  { %1425 = vmatpush1.bf16.msra.mxu0 %v2069_v7  ;;  %1385 = vmatprep.subr.bf16.mxu1 %v2070_v8  ;;  %v2087_v19 = vld [vmem:[#allocation2 + $0x1e0] ss:$12 sps:$4 sm:$0xff]   ;;  %v2090_v21 = vld [vmem:[#allocation2 + $0x1fc] ss:$12 sps:$4 sm:$0xff]   ;;  %v2092_v22 = vld [vmem:[#allocation2 + $0x78] ss:$12 sps:$4 sm:$0xff]  }
  0x1b   :  { %1426 = vmatprep.subr.bf16.mxu0 %v2072_v9  ;;  %v2093_v23 = vld [vmem:[#allocation2 + $0x1f8] ss:$12 sps:$4 sm:$0xff]   ;;  %v2094_v24 = vld [vmem:[#allocation2 + $0x94] ss:$12 sps:$4 sm:$0xff]   ;;  %v2098_v26 = vld [vmem:[#allocation2 + $0x90] ss:$12 sps:$4 sm:$0xff]  }
  0x1c   :  { %v2096_v25 = vld [vmem:[#allocation2 + $0x214] ss:$12 sps:$4 sm:$0xff]   ;;  %v2099_v27 = vld [vmem:[#allocation2 + $0x210] ss:$12 sps:$4 sm:$0xff]   ;;  %v2100_v28 = vld [vmem:[#allocation2 + $0xac] ss:$12 sps:$4 sm:$0xff]  }
  0x1d   :  { %1386 = vmatpush1.bf16.msra.mxu1 %v2074_v10  ;;  %v2102_v29 = vld [vmem:[#allocation2 + $0x22c] ss:$12 sps:$4 sm:$0xff]   ;;  %v2104_v30 = vld [vmem:[#allocation2 + $0xa8] ss:$12 sps:$4 sm:$0xff]   ;;  %v2106_v32 = vld [vmem:[#allocation2 + $0xc4] ss:$12 sps:$4 sm:$0xff]  }
  0x1e   :  { %1427 = vmatpush1.bf16.msra.mxu0 %v2075_v11  ;;  %1387 = vmatprep.subr.bf16.mxu1 %v2076_v12  ;;  %v2105_v31 = vld [vmem:[#allocation2 + $0x228] ss:$12 sps:$4 sm:$0xff]   ;;  %v2108_v33 = vld [vmem:[#allocation2 + $0x244] ss:$12 sps:$4 sm:$0xff]   ;;  %v2110_v34 = vld [vmem:[#allocation2 + $0xc0] ss:$12 sps:$4 sm:$0xff]  }
  0x1f   :  { %1428 = vmatprep.subr.bf16.mxu0 %v2078_v13  ;;  %v2111_v35 = vld [vmem:[#allocation2 + $0x240] ss:$12 sps:$4 sm:$0xff]   ;;  %v2381_v36 = vmov 1983009808   ;;  %v2112_v39 = vld [vmem:[#allocation2 + $0xdc] ss:$12 sps:$4 sm:$0xff]  }
  0x20   :  { %v36_v37 = vunpack.c.l.s4 %v2381_v36  ;;  %v2114_v40 = vld [vmem:[#allocation2 + $0x25c] ss:$12 sps:$4 sm:$0xff]   ;;  %v2116_v41 = vld [vmem:[#allocation2 + $0xd8] ss:$12 sps:$4 sm:$0xff]   ;;  %v2415_v43 = vshrl.u32 %v38_v38, 7  ;;  %vm1705_vm0 = vcmask 1041408  }
  0x21   :  { %1388 = vmatpush1.bf16.msra.mxu1 %v2080_v14  ;;  %v2117_v44 = vld [vmem:[#allocation2 + $0x258] ss:$12 sps:$4 sm:$0xff]   ;;  %v2118_v45 = vld [vmem:[#allocation2 + $0xf4] ss:$12 sps:$4 sm:$0xff]   ;;  %v2122_v47 = vld [vmem:[#allocation2 + $0xf0] ss:$12 sps:$4 sm:$0xff]  }
  0x22   :  { %1429 = vmatpush1.bf16.msra.mxu0 %v2081_v15  ;;  %1389 = vmatprep.subr.bf16.mxu1 %v2082_v16  ;;  %v37_v42 = vunpack.c.0.s8 %v36_v37  ;;  %v2120_v46 = vld [vmem:[#allocation2 + $0x274] ss:$12 sps:$4 sm:$0xff]   ;;  %v2123_v48 = vld [vmem:[#allocation2 + $0x270] ss:$12 sps:$4 sm:$0xff]   ;;  %v2124_v50 = vld [vmem:[#allocation2 + $0x10c] ss:$12 sps:$4 sm:$0xff]  }
  0x23   :  { %1430 = vmatprep.subr.bf16.mxu0 %v2084_v17  ;;  %v2126_v51 = vld [vmem:[#allocation2 + $0x28c] ss:$12 sps:$4 sm:$0xff]   ;;  %v2128_v52 = vld [vmem:[#allocation2 + $0x108] ss:$12 sps:$4 sm:$0xff]   ;;  %v30_v53 = vld [vmem:[%s2490_s0] sm:$0xff] }
  0x24   :  { %v2418_v49 = vsub.s32 %v37_v42, %v2415_v43  ;;  %v2129_v54 = vld [vmem:[#allocation2 + $0x288] ss:$12 sps:$4 sm:$0xff]   ;;  %v34_v56 = vcombine.high %v30_v53, %v30_v53  ;;  %v2130_v57 = vld [vmem:[#allocation2 + $0x124] ss:$12 sps:$4 sm:$0xff]   ;;  %v2134_v61 = vld [vmem:[#allocation2 + $0x120] ss:$12 sps:$4 sm:$0xff]  }
  0x25   :  { %1390 = vmatpush1.bf16.msra.mxu1 %v2086_v18  ;;  %v2132_v58 = vld [vmem:[#allocation2 + $0x2a4] ss:$12 sps:$4 sm:$0xff]   ;;  %v2135_v62 = vld [vmem:[#allocation2 + $0x2a0] ss:$12 sps:$4 sm:$0xff]   ;;  %v2136_v1 = vld [vmem:[#allocation2 + $0x13c] ss:$12 sps:$4 sm:$0xff]  }
  0x26   :  { %1431 = vmatpush1.bf16.msra.mxu0 %v2087_v19  ;;  %1391 = vmatprep.subr.bf16.mxu1 %v2088_v20  ;;  %v41_v55 = vrot.slane %v30_v53, %v2418_v49  ;;  %v48_v60 = vrot.slane %v34_v56, %v2418_v49  ;;  %v2138_v2 = vld [vmem:[#allocation2 + $0x2bc] ss:$12 sps:$4 sm:$0xff]   ;;  %v2140_v4 = vld [vmem:[#allocation2 + $0x138] ss:$12 sps:$4 sm:$0xff]   ;;  %v2142_v6 = vld [vmem:[#allocation2 + $0x154] ss:$12 sps:$4 sm:$0xff]  }
  0x27   :  { %1432 = vmatprep.subr.bf16.mxu0 %v2090_v21  ;;  %v2141_v5 = vld [vmem:[#allocation2 + $0x2b8] ss:$12 sps:$4 sm:$0xff]   ;;  %v2144_v7 = vld [vmem:[#allocation2 + $0x2d4] ss:$12 sps:$4 sm:$0xff]   ;;  %v2146_v8 = vld [vmem:[#allocation2 + $0x150] ss:$12 sps:$4 sm:$0xff]  }
  0x28   :  { %v49_v59 = vcombine.high %v41_v55, %v41_v55  ;;  %v50_v0 = vcombine.high %v48_v60, %v48_v60  ;;  %v2147_v9 = vld [vmem:[#allocation2 + $0x2d0] ss:$12 sps:$4 sm:$0xff]   ;;  %v2148_v10 = vld [vmem:[#allocation2 + $0x16c] ss:$12 sps:$4 sm:$0xff]   ;;  %v2152_v12 = vld [vmem:[#allocation2 + $0x168] ss:$12 sps:$4 sm:$0xff]   ;;  %v2428_v17 = vpack.c.bf16 %v41_v55, %v41_v55  ;;  %v2430_v18 = vpack.c.bf16 %v48_v60, %v48_v60 }
  0x29   :  { %1392 = vmatpush1.bf16.msra.mxu1 %v2092_v22  ;;  %v2150_v11 = vld [vmem:[#allocation2 + $0x2ec] ss:$12 sps:$4 sm:$0xff]   ;;  %v2153_v13 = vld [vmem:[#allocation2 + $0x2e8] ss:$12 sps:$4 sm:$0xff]   ;;  %v2157_v14 = vld [vmem:[#allocation2 + $0x304] ss:$12 sps:$4 sm:$0xff]  }
  0x2a   :  { %1433 = vmatpush1.bf16.msra.mxu0 %v2093_v23  ;;  %1393 = vmatprep.subr.bf16.mxu1 %v2094_v24  ;;  %v77_v63 = vpack.c.bf16 %v49_v59, %v49_v59  ;;  %v2425_v3 = vpack.c.bf16 %v50_v0, %v50_v0  ;;  %v2158_v15 = vld [vmem:[#allocation2 + $0xc8] ss:$12 sps:$4 sm:$0xff]   ;;  %v2155_v16 = vld [vmem:[#allocation2 + $0x300] ss:$12 sps:$4 sm:$0xff]   ;;  %v2160_v22 = vld [vmem:[#allocation2 + $0x318] ss:$12 sps:$4 sm:$0xff]  }
  0x2b   :  { %1434 = vmatprep.subr.bf16.mxu0 %v2096_v25  ;;  %v2159_v19 = vld [vmem:[#allocation2 + $0x8] ss:$12 sps:$4 sm:$0xff]   ;;  %v2163_v21 = vld [vmem:[#allocation2 + $0xe0] ss:$12 sps:$4 sm:$0xff]   ;;  %v2168_v25 = vld [vmem:[#allocation2 + $0xf8] ss:$12 sps:$4 sm:$0xff]  }
  0x2c   :  { %1413 = vmatprep.mubr.bf16.mxu1 %v77_v63  ;;  %1454 = vmatprep.mubr.bf16.mxu0 %v2425_v3  ;;  %v2162_v20 = vld [vmem:[#allocation2 + $0x31c] ss:$12 sps:$4 sm:$0xff]   ;;  %v2164_v23 = vld [vmem:[#allocation2 + $0x20] ss:$12 sps:$4 sm:$0xff]   ;;  %v2180_v38 = vld [vmem:[#allocation2 + $0x378] ss:$12 sps:$4 sm:$0xff]  }
  0x2d   :  { %1394 = vmatpush1.bf16.msra.mxu1 %v2098_v26  ;;  %v2167_v24 = vld [vmem:[#allocation2 + $0x334] ss:$12 sps:$4 sm:$0xff]   ;;  %v2165_v26 = vld [vmem:[#allocation2 + $0x330] ss:$12 sps:$4 sm:$0xff]  }
  0x2e   :  { %1435 = vmatpush1.bf16.msra.mxu0 %v2099_v27  ;;  %1395 = vmatprep.subr.bf16.mxu1 %v2100_v28  ;;  %v2169_v27 = vld [vmem:[#allocation2 + $0x38] ss:$12 sps:$4 sm:$0xff]   ;;  %v2182_v36 = vld [vmem:[#allocation2 + $0x37c] ss:$12 sps:$4 sm:$0xff]   ;;  %v2183_v37 = vld [vmem:[#allocation2 + $0x140] ss:$12 sps:$4 sm:$0xff]  }
  0x2f   :  { %1436 = vmatprep.subr.bf16.mxu0 %v2102_v29  ;;  %v2172_v28 = vld [vmem:[#allocation2 + $0x34c] ss:$12 sps:$4 sm:$0xff]   ;;  %v2173_v29 = vld [vmem:[#allocation2 + $0x110] ss:$12 sps:$4 sm:$0xff]   ;;  %v2199_v53 = vld [vmem:[#allocation2 + $0x188] ss:$12 sps:$4 sm:$0xff]  }
  0x30   :  { %v2185_v42 = vld [vmem:[#allocation2 + $0x390] ss:$12 sps:$4 sm:$0xff]   ;;  %v2203_v56 = vld [vmem:[#allocation2 + $0x260] ss:$12 sps:$4 sm:$0xff]  }
  0x31   :  { %1396 = vmatpush1.bf16.msra.mxu1 %v2104_v30  ;;  %v2170_v30 = vld [vmem:[#allocation2 + $0x348] ss:$12 sps:$4 sm:$0xff]   ;;  %v2204_v59 = vld [vmem:[#allocation2 + $0x1a0] ss:$12 sps:$4 sm:$0xff]   ;;  %v2205_v0 = vld [vmem:[#allocation2 + $0x3f0] ss:$12 sps:$4 sm:$0xff]  }
  0x32   :  { %1437 = vmatpush1.bf16.msra.mxu0 %v2105_v31  ;;  %1397 = vmatprep.subr.bf16.mxu1 %v2106_v32  ;;  %v2174_v31 = vld [vmem:[#allocation2 + $0x50] ss:$12 sps:$4 sm:$0xff]  }
  0x33   :  { %1438 = vmatprep.subr.bf16.mxu0 %v2108_v33  ;;  %v2177_v32 = vld [vmem:[#allocation2 + $0x364] ss:$12 sps:$4 sm:$0xff]   ;;  %v2178_v33 = vld [vmem:[#allocation2 + $0x128] ss:$12 sps:$4 sm:$0xff]  }
  0x34   :  { %v2202_v55 = vld [vmem:[#allocation2 + $0x3dc] ss:$12 sps:$4 sm:$0xff]  }
  0x35   :  { %1398 = vmatpush1.bf16.msra.mxu1 %v2110_v34  ;;  %v2175_v34 = vld [vmem:[#allocation2 + $0x360] ss:$12 sps:$4 sm:$0xff]  }
  0x36   :  { %1439 = vmatpush1.bf16.msra.mxu0 %v2111_v35  ;;  %1399 = vmatprep.subr.bf16.mxu1 %v2112_v39  ;;  %v2179_v35 = vld [vmem:[#allocation2 + $0x68] ss:$12 sps:$4 sm:$0xff]   ;;  %v2184_v39 = vld [vmem:[#allocation2 + $0x80] ss:$12 sps:$4 sm:$0xff]  }
  0x37   :  { %1440 = vmatprep.subr.bf16.mxu0 %v2114_v40  ;;  %v2187_v40 = vld [vmem:[#allocation2 + $0x394] ss:$12 sps:$4 sm:$0xff]  }
  0x39   :  { %1400 = vmatpush1.bf16.msra.mxu1 %v2116_v41  ;;  %v2188_v41 = vld [vmem:[#allocation2 + $0x158] ss:$12 sps:$4 sm:$0xff]  }
  0x3a   :  { %1441 = vmatpush1.bf16.msra.mxu0 %v2117_v44  ;;  %1401 = vmatprep.subr.bf16.mxu1 %v2118_v45  ;;  %v2189_v44 = vld [vmem:[#allocation2 + $0x98] ss:$12 sps:$4 sm:$0xff]  }
  0x3b   :  { %1442 = vmatprep.subr.bf16.mxu0 %v2120_v46  ;;  %v2192_v45 = vld [vmem:[#allocation2 + $0x3ac] ss:$12 sps:$4 sm:$0xff]   ;;  %v2193_v46 = vld [vmem:[#allocation2 + $0x170] ss:$12 sps:$4 sm:$0xff]  }
  0x3d   :  { %1402 = vmatpush1.bf16.msra.mxu1 %v2122_v47  ;;  %v2190_v47 = vld [vmem:[#allocation2 + $0x3a8] ss:$12 sps:$4 sm:$0xff]  }
  0x3e   :  { %1443 = vmatpush1.bf16.msra.mxu0 %v2123_v48  ;;  %1403 = vmatprep.subr.bf16.mxu1 %v2124_v50  ;;  %v2194_v48 = vld [vmem:[#allocation2 + $0xb0] ss:$12 sps:$4 sm:$0xff]  }
  0x3f   :  { %1444 = vmatprep.subr.bf16.mxu0 %v2126_v51  ;;  %v2197_v50 = vld [vmem:[#allocation2 + $0x3c4] ss:$12 sps:$4 sm:$0xff]   ;;  %v2198_v51 = vld [vmem:[#allocation2 + $0x248] ss:$12 sps:$4 sm:$0xff]  }
  0x41   :  { %1404 = vmatpush1.bf16.msra.mxu1 %v2128_v52  ;;  %v2195_v52 = vld [vmem:[#allocation2 + $0x3c0] ss:$12 sps:$4 sm:$0xff]  }
  0x42   :  { %1445 = vmatpush1.bf16.msra.mxu0 %v2129_v54  ;;  %1405 = vmatprep.subr.bf16.mxu1 %v2130_v57  ;;  %v31_v54 = vld [vmem:[%s2490_s0 + $0x8] sm:$0xff] }
  0x43   :  { %1446 = vmatprep.subr.bf16.mxu0 %v2132_v58  ;;  %v2438_v57 = vrot.slane %v31_v54, %v2418_v49  ;;  %v2200_v58 = vld [vmem:[#allocation2 + $0x3d8] ss:$12 sps:$4 sm:$0xff]  }
  0x45   :  { %1406 = vmatpush1.bf16.msra.mxu1 %v2134_v61  ;;  %v66_v60 = vcombine.high %v2438_v57, %v2438_v57  ;;  %v2207_v61 = vld [vmem:[#allocation2 + $0x3f4] ss:$12 sps:$4 sm:$0xff]  }
  0x46   :  { %1447 = vmatpush1.bf16.msra.mxu0 %v2135_v62  ;;  %1407 = vmatprep.subr.bf16.mxu1 %v2136_v1  ;;  %v2208_v62 = vld [vmem:[#allocation2 + $0x278] ss:$12 sps:$4 sm:$0xff]  }
  0x47   :  { %1448 = vmatprep.subr.bf16.mxu0 %v2138_v2  ;;  %v2209_v1 = vld [vmem:[#allocation2 + $0x1b8] ss:$12 sps:$4 sm:$0xff]  }
  0x48   :  { %v2212_v2 = vld [vmem:[#allocation2 + $0x40c] ss:$12 sps:$4 sm:$0xff]  }
  0x49   :  { %1408 = vmatpush1.bf16.msra.mxu1 %v2140_v4  ;;  %v2213_v4 = vld [vmem:[#allocation2 + $0x290] ss:$12 sps:$4 sm:$0xff]  }
  0x4a   :  { %1449 = vmatpush1.bf16.msra.mxu0 %v2141_v5  ;;  %1409 = vmatprep.subr.bf16.mxu1 %v2142_v6  ;;  %v2210_v5 = vld [vmem:[#allocation2 + $0x408] ss:$12 sps:$4 sm:$0xff]   ;;  %v2214_v6 = vld [vmem:[#allocation2 + $0x1d0] ss:$12 sps:$4 sm:$0xff]  }
  0x4b   :  { %1450 = vmatprep.subr.bf16.mxu0 %v2144_v7  ;;  %v2217_v7 = vld [vmem:[#allocation2 + $0x424] ss:$12 sps:$4 sm:$0xff]  }
  0x4d   :  { %1410 = vmatpush1.bf16.msra.mxu1 %v2146_v8  ;;  %v2218_v8 = vld [vmem:[#allocation2 + $0x2a8] ss:$12 sps:$4 sm:$0xff]  }
  0x4e   :  { %1451 = vmatpush1.bf16.msra.mxu0 %v2147_v9  ;;  %1411 = vmatprep.subr.bf16.mxu1 %v2148_v10  ;;  %v2215_v9 = vld [vmem:[#allocation2 + $0x420] ss:$12 sps:$4 sm:$0xff]   ;;  %v2222_v10 = vld [vmem:[#allocation2 + $0x43c] ss:$12 sps:$4 sm:$0xff]  }
  0x4f   :  { %1452 = vmatprep.subr.bf16.mxu0 %v2150_v11  ;;  %v2223_v11 = vld [vmem:[#allocation2 + $0x2c0] ss:$12 sps:$4 sm:$0xff]  }
  0x51   :  { %1412 = vmatpush1.bf16.msra.mxu1 %v2152_v12  ;;  %v2220_v12 = vld [vmem:[#allocation2 + $0x438] ss:$12 sps:$4 sm:$0xff]  }
  0x52   :  { %1453 = vmatpush1.bf16.msra.mxu0 %v2153_v13  ;;  %1953 = vmatprep.subr.bf16.mxu1 %v2158_v15  ;;  %v2224_v13 = vld [vmem:[#allocation2 + $0x200] ss:$12 sps:$4 sm:$0xff]   ;;  %v2228_v15 = vld [vmem:[#allocation2 + $0x2d8] ss:$12 sps:$4 sm:$0xff]  }
  0x53   :  { %1463 = vmatprep.subr.bf16.mxu0 %v2157_v14  ;;  %v2227_v14 = vld [vmem:[#allocation2 + $0x454] ss:$12 sps:$4 sm:$0xff]  }
  0x54   :  { %1414 = vmatmul.mubr.bf16.vlgmr.msra.gmra.mrb[0].mxu1 %v2428_v17 }
  0x55   :  { %1455 = vmatmul.mubr.bf16.vlgmr.msra.gmra.mrb[0].mxu0 %v2430_v18  ;;  %1954 = vmatpush3.bf16.msra.mxu1 %v2159_v19  ;;  %v2229_v19 = vld [vmem:[#allocation2 + $0x218] ss:$12 sps:$4 sm:$0xff]  }
  0x56   :  { %1464 = vmatpush1.bf16.msra.mxu0 %v2155_v16  ;;  %1955 = vmatprep.subr.bf16.mxu1 %v2163_v21  ;;  %v2225_v16 = vld [vmem:[#allocation2 + $0x450] ss:$12 sps:$4 sm:$0xff]  }
  0x57   :  { %1465 = vmatprep.subr.bf16.mxu0 %v2162_v20  ;;  %1577 = vmatprep.mubr.bf16.mxu1 %v77_v63  ;;  %v2443_v63 = vpack.c.bf16 %v66_v60, %v66_v60  ;;  %v2232_v20 = vld [vmem:[#allocation2 + $0x46c] ss:$12 sps:$4 sm:$0xff]   ;;  %v2233_v21 = vld [vmem:[#allocation2 + $0x2f0] ss:$12 sps:$4 sm:$0xff]  }
  0x58   :  { %v2277_v60 = vld [vmem:[#allocation2 + $0x544] ss:$12 sps:$4 sm:$0xff]  }
  0x59   :  { %1956 = vmatpush3.bf16.msra.mxu1 %v2164_v23  ;;  %1495 = vmatprep.mubr.bf16.mxu0 %v2443_v63  ;;  %v2230_v23 = vld [vmem:[#allocation2 + $0x468] ss:$12 sps:$4 sm:$0xff]  }
  0x5a   :  { %1466 = vmatpush1.bf16.msra.mxu0 %v2160_v22  ;;  %1957 = vmatprep.subr.bf16.mxu1 %v2168_v25  ;;  %v2237_v25 = vld [vmem:[#allocation2 + $0x484] ss:$12 sps:$4 sm:$0xff]  }
  0x5b   :  { %1467 = vmatprep.subr.bf16.mxu0 %v2167_v24  ;;  %v2234_v24 = vld [vmem:[#allocation2 + $0x230] ss:$12 sps:$4 sm:$0xff]  }
  0x5d   :  { %1958 = vmatpush3.bf16.msra.mxu1 %v2169_v27 }
  0x5e   :  { %1468 = vmatpush1.bf16.msra.mxu0 %v2165_v26  ;;  %1959 = vmatprep.subr.bf16.mxu1 %v2173_v29  ;;  %v2238_v26 = vld [vmem:[#allocation2 + $0x3c8] ss:$12 sps:$4 sm:$0xff]   ;;  %v2454_v29 = vpack.c.bf16 %v2438_v57, %v2438_v57  ;;  %v2273_v57 = vld [vmem:[#allocation2 + $0x470] ss:$12 sps:$4 sm:$0xff]  }
  0x5f   :  { %1469 = vmatprep.subr.bf16.mxu0 %v2172_v28  ;;  %v2235_v28 = vld [vmem:[#allocation2 + $0x480] ss:$12 sps:$4 sm:$0xff]  }
  0x61   :  { %1960 = vmatpush3.bf16.msra.mxu1 %v2174_v31  ;;  %v2243_v31 = vld [vmem:[#allocation2 + $0x3e0] ss:$12 sps:$4 sm:$0xff]  }
  0x62   :  { %1470 = vmatpush1.bf16.msra.mxu0 %v2170_v30  ;;  %1961 = vmatprep.subr.bf16.mxu1 %v2178_v33  ;;  %v2239_v30 = vld [vmem:[#allocation2 + $0x308] ss:$12 sps:$4 sm:$0xff]  }
  0x63   :  { %1471 = vmatprep.subr.bf16.mxu0 %v2177_v32  ;;  %v2240_v32 = vld [vmem:[#allocation2 + $0x498] ss:$12 sps:$4 sm:$0xff]  }
  0x65   :  { %1962 = vmatpush3.bf16.msra.mxu1 %v2179_v35  ;;  %v2247_v35 = vld [vmem:[#allocation2 + $0x4b4] ss:$12 sps:$4 sm:$0xff]  }
  0x66   :  { %1472 = vmatpush1.bf16.msra.mxu0 %v2175_v34  ;;  %1963 = vmatprep.subr.bf16.mxu1 %v2183_v37  ;;  %v2244_v34 = vld [vmem:[#allocation2 + $0x320] ss:$12 sps:$4 sm:$0xff]   ;;  %v2245_v37 = vld [vmem:[#allocation2 + $0x4b0] ss:$12 sps:$4 sm:$0xff]  }
  0x67   :  { %1473 = vmatprep.subr.bf16.mxu0 %v2182_v36  ;;  %v2248_v36 = vld [vmem:[#allocation2 + $0x3f8] ss:$12 sps:$4 sm:$0xff]  }
  0x69   :  { %1964 = vmatpush3.bf16.msra.mxu1 %v2184_v39  ;;  %v2253_v39 = vld [vmem:[#allocation2 + $0x410] ss:$12 sps:$4 sm:$0xff]  }
  0x6a   :  { %1474 = vmatpush1.bf16.msra.mxu0 %v2180_v38  ;;  %1965 = vmatprep.subr.bf16.mxu1 %v2188_v41  ;;  %v2249_v38 = vld [vmem:[#allocation2 + $0x338] ss:$12 sps:$4 sm:$0xff]   ;;  %v2254_v41 = vld [vmem:[#allocation2 + $0x350] ss:$12 sps:$4 sm:$0xff]  }
  0x6b   :  { %1475 = vmatprep.subr.bf16.mxu0 %v2187_v40  ;;  %v2250_v40 = vld [vmem:[#allocation2 + $0x4c8] ss:$12 sps:$4 sm:$0xff]  }
  0x6d   :  { %1966 = vmatpush3.bf16.msra.mxu1 %v2189_v44  ;;  %v2258_v44 = vld [vmem:[#allocation2 + $0x428] ss:$12 sps:$4 sm:$0xff]  }
  0x6e   :  { %1476 = vmatpush1.bf16.msra.mxu0 %v2185_v42  ;;  %1967 = vmatprep.subr.bf16.mxu1 %v2193_v46  ;;  %v2257_v42 = vld [vmem:[#allocation2 + $0x4e4] ss:$12 sps:$4 sm:$0xff]   ;;  %v2259_v46 = vld [vmem:[#allocation2 + $0x368] ss:$12 sps:$4 sm:$0xff]  }
  0x6f   :  { %1477 = vmatprep.subr.bf16.mxu0 %v2192_v45  ;;  %v2255_v45 = vld [vmem:[#allocation2 + $0x4e0] ss:$12 sps:$4 sm:$0xff]  }
  0x71   :  { %1968 = vmatpush3.bf16.msra.mxu1 %v2194_v48  ;;  %v2263_v48 = vld [vmem:[#allocation2 + $0x440] ss:$12 sps:$4 sm:$0xff]  }
  0x72   :  { %1478 = vmatpush1.bf16.msra.mxu0 %v2190_v47  ;;  %1975 = vmatprep.subr.bf16.mxu1 %v2198_v51  ;;  %v2262_v47 = vld [vmem:[#allocation2 + $0x4fc] ss:$12 sps:$4 sm:$0xff]   ;;  %v2264_v51 = vld [vmem:[#allocation2 + $0x380] ss:$12 sps:$4 sm:$0xff]  }
  0x73   :  { %1479 = vmatprep.subr.bf16.mxu0 %v2197_v50  ;;  %v2260_v50 = vld [vmem:[#allocation2 + $0x4f8] ss:$12 sps:$4 sm:$0xff]  }
  0x74   :  { %1578 = vmatmul.mubr.bf16.vlgmr.msra.gmra.mrb[4].mxu1 %v2428_v17  ;;  %v51_v17 = vcombine.high %v31_v54, %v31_v54  ;;  %v2265_v54 = vld [vmem:[#allocation2 + $0x510] ss:$12 sps:$4 sm:$0xff]  }
  0x75   :  { %1976 = vmatpush3.bf16.msra.mxu1 %v2199_v53  ;;  %1617 = vmatprep.mubr.bf16.mxu1 %v2425_v3  ;;  %v2219_v3 = vld [vmem:[#allocation2 + $0x1e8] ss:$12 sps:$4 sm:$0xff]   ;;  %v2268_v53 = vld [vmem:[#allocation2 + $0x458] ss:$12 sps:$4 sm:$0xff]  }
  0x76   :  { %1480 = vmatpush1.bf16.msra.mxu0 %v2195_v52  ;;  %1977 = vmatprep.subr.bf16.mxu1 %v2203_v56  ;;  %v2448_v22 = vrot.slane %v51_v17, %v2418_v49  ;;  %v2242_v49 = vld [vmem:[#allocation2 + $0x49c] ss:$12 sps:$4 sm:$0xff]   ;;  %v2267_v52 = vld [vmem:[#allocation2 + $0x514] ss:$12 sps:$4 sm:$0xff]   ;;  %v2272_v56 = vld [vmem:[#allocation2 + $0x52c] ss:$12 sps:$4 sm:$0xff]  }
  0x77   :  { %1481 = vmatprep.subr.bf16.mxu0 %v2202_v55  ;;  %v2269_v55 = vld [vmem:[#allocation2 + $0x398] ss:$12 sps:$4 sm:$0xff]   ;;  %v2303_v17 = vld [vmem:[#allocation2 + $0x5c0] ss:$12 sps:$4 sm:$0xff]  }
  0x78   :  { %v67_v27 = vcombine.high %v2448_v22, %v2448_v22 }
  0x79   :  { %1978 = vmatpush3.bf16.msra.mxu1 %v2204_v59  ;;  %v2274_v59 = vld [vmem:[#allocation2 + $0x3b0] ss:$12 sps:$4 sm:$0xff]  }
  0x7a   :  { %1482 = vmatpush1.bf16.msra.mxu0 %v2200_v58  ;;  %1979 = vmatprep.subr.bf16.mxu1 %v2208_v62  ;;  %v2456_v33 = vpack.c.bf16 %v67_v27, %v67_v27  ;;  %v2270_v58 = vld [vmem:[#allocation2 + $0x528] ss:$12 sps:$4 sm:$0xff]   ;;  %v2275_v62 = vld [vmem:[#allocation2 + $0x540] ss:$12 sps:$4 sm:$0xff]   ;;  %v2313_v27 = vld [vmem:[#allocation2 + $0x5f0] ss:$12 sps:$4 sm:$0xff]  }
  0x7b   :  { %1483 = vmatprep.subr.bf16.mxu0 %v2207_v61  ;;  %v2278_v61 = vld [vmem:[#allocation2 + $0x548] ss:$12 sps:$4 sm:$0xff]  }
  0x7d   :  { %1980 = vmatpush3.bf16.msra.mxu1 %v2209_v1  ;;  %v2283_v1 = vld [vmem:[#allocation2 + $0x560] ss:$12 sps:$4 sm:$0xff]  }
  0x7e   :  { %1484 = vmatpush1.bf16.msra.mxu0 %v2205_v0  ;;  %1981 = vmatprep.subr.bf16.mxu1 %v2213_v4  ;;  %v2282_v0 = vld [vmem:[#allocation2 + $0x55c] ss:$12 sps:$4 sm:$0xff]   ;;  %v2284_v4 = vld [vmem:[#allocation2 + $0x4a0] ss:$12 sps:$4 sm:$0xff]  }
  0x7f   :  { %1485 = vmatprep.subr.bf16.mxu0 %v2212_v2  ;;  %v2280_v2 = vld [vmem:[#allocation2 + $0x558] ss:$12 sps:$4 sm:$0xff]  }
  0x81   :  { %1982 = vmatpush3.bf16.msra.mxu1 %v2214_v6  ;;  %v2288_v6 = vld [vmem:[#allocation2 + $0x578] ss:$12 sps:$4 sm:$0xff]  }
  0x82   :  { %1486 = vmatpush1.bf16.msra.mxu0 %v2210_v5  ;;  %1983 = vmatprep.subr.bf16.mxu1 %v2218_v8  ;;  %v2287_v5 = vld [vmem:[#allocation2 + $0x574] ss:$12 sps:$4 sm:$0xff]   ;;  %v2289_v8 = vld [vmem:[#allocation2 + $0x4b8] ss:$12 sps:$4 sm:$0xff]  }
  0x83   :  { %1487 = vmatprep.subr.bf16.mxu0 %v2217_v7  ;;  %v2285_v7 = vld [vmem:[#allocation2 + $0x570] ss:$12 sps:$4 sm:$0xff]  }
  0x85   :  { %1984 = vmatpush3.bf16.msra.mxu1 %v2219_v3  ;;  %v2293_v3 = vld [vmem:[#allocation2 + $0x590] ss:$12 sps:$4 sm:$0xff]  }
  0x86   :  { %1488 = vmatpush1.bf16.msra.mxu0 %v2215_v9  ;;  %1985 = vmatprep.subr.bf16.mxu1 %v2223_v11  ;;  %v2292_v9 = vld [vmem:[#allocation2 + $0x58c] ss:$12 sps:$4 sm:$0xff]   ;;  %v2294_v11 = vld [vmem:[#allocation2 + $0x4d0] ss:$12 sps:$4 sm:$0xff]  }
  0x87   :  { %1489 = vmatprep.subr.bf16.mxu0 %v2222_v10  ;;  %v2290_v10 = vld [vmem:[#allocation2 + $0x588] ss:$12 sps:$4 sm:$0xff]  }
  0x89   :  { %1986 = vmatpush3.bf16.msra.mxu1 %v2224_v13  ;;  %v2298_v13 = vld [vmem:[#allocation2 + $0x5a8] ss:$12 sps:$4 sm:$0xff]  }
  0x8a   :  { %1490 = vmatpush1.bf16.msra.mxu0 %v2220_v12  ;;  %1987 = vmatprep.subr.bf16.mxu1 %v2228_v15  ;;  %v2297_v12 = vld [vmem:[#allocation2 + $0x5a4] ss:$12 sps:$4 sm:$0xff]   ;;  %v2299_v15 = vld [vmem:[#allocation2 + $0x4e8] ss:$12 sps:$4 sm:$0xff]  }
  0x8b   :  { %1491 = vmatprep.subr.bf16.mxu0 %v2227_v14  ;;  %v2295_v14 = vld [vmem:[#allocation2 + $0x5a0] ss:$12 sps:$4 sm:$0xff]  }
  0x8d   :  { %1988 = vmatpush3.bf16.msra.mxu1 %v2229_v19  ;;  %v2300_v19 = vld [vmem:[#allocation2 + $0x5b8] ss:$12 sps:$4 sm:$0xff]  }
  0x8e   :  { %1492 = vmatpush1.bf16.msra.mxu0 %v2225_v16  ;;  %1989 = vmatprep.subr.bf16.mxu1 %v2233_v21  ;;  %v2302_v16 = vld [vmem:[#allocation2 + $0x5bc] ss:$12 sps:$4 sm:$0xff]   ;;  %v2307_v21 = vld [vmem:[#allocation2 + $0x5d4] ss:$12 sps:$4 sm:$0xff]  }
  0x8f   :  { %1493 = vmatprep.subr.bf16.mxu0 %v2232_v20  ;;  %v2304_v20 = vld [vmem:[#allocation2 + $0x500] ss:$12 sps:$4 sm:$0xff]  }
  0x91   :  { %1990 = vmatpush3.bf16.msra.mxu1 %v2234_v24  ;;  %v2305_v24 = vld [vmem:[#allocation2 + $0x5d0] ss:$12 sps:$4 sm:$0xff]  }
  0x92   :  { %1494 = vmatpush1.bf16.msra.mxu0 %v2230_v23  ;;  %1997 = vmatprep.subr.bf16.mxu1 %v2238_v26  ;;  %v2308_v23 = vld [vmem:[#allocation2 + $0x5d8] ss:$12 sps:$4 sm:$0xff]  }
  0x93   :  { %1504 = vmatprep.subr.bf16.mxu0 %v2237_v25  ;;  %v2309_v25 = vld [vmem:[#allocation2 + $0x518] ss:$12 sps:$4 sm:$0xff]  }
  0x94   :  { %1618 = vmatmul.mubr.bf16.vlgmr.msra.gmra.mrb[8].mxu1 %v2430_v18  ;;  %v2252_v18 = vld [vmem:[#allocation2 + $0x4cc] ss:$12 sps:$4 sm:$0xff]  }
  0x95   :  { %1496 = vmatmul.mubr.bf16.vlgmr.msra.gmra.mrb[0].mxu0 %v2454_v29  ;;  %1998 = vmatpush3.bf16.msra.mxu1 %v2239_v30  ;;  %v2312_v26 = vld [vmem:[#allocation2 + $0x5ec] ss:$12 sps:$4 sm:$0xff]   ;;  %v82_v30 = vpack.c.bf16 %v2448_v22, %v2448_v22 }
  0x96   :  { %1505 = vmatpush1.bf16.msra.mxu0 %v2235_v28  ;;  %1999 = vmatprep.subr.bf16.mxu1 %v2243_v31  ;;  %v2310_v28 = vld [vmem:[#allocation2 + $0x5e8] ss:$12 sps:$4 sm:$0xff]  }
  0x97   :  { %1506 = vmatprep.subr.bf16.mxu0 %v2242_v49  ;;  %1657 = vmatprep.mubr.bf16.mxu1 %v2443_v63  ;;  %v2279_v63 = vld [vmem:[#allocation2 + $0x488] ss:$12 sps:$4 sm:$0xff]  }
  0x98   :  { %1536 = vmatprep.mubr.bf16.mxu0 %v2456_v33 }
  0x99   :  { %2000 = vmatpush3.bf16.msra.mxu1 %v2244_v34 }
  0x9a   :  { %1507 = vmatpush1.bf16.msra.mxu0 %v2240_v32  ;;  %2001 = vmatprep.subr.bf16.mxu1 %v2248_v36 }
  0x9b   :  { %1508 = vmatprep.subr.bf16.mxu0 %v2247_v35 }
  0x9d   :  { %2002 = vmatpush3.bf16.msra.mxu1 %v2249_v38 }
  0x9e   :  { %1509 = vmatpush1.bf16.msra.mxu0 %v2245_v37  ;;  %2003 = vmatprep.subr.bf16.mxu1 %v2253_v39  ;;  %v340_v39 = vld [vmem:[%s2492_s2] sm:$0x7]  ;;  %s2382_s2 = smov [#allocation5]  }
  0x9f   :  { %1510 = vmatprep.subr.bf16.mxu0 %v2252_v18  ;;  %v352_v18 = vsub.s32 2, %v2415_v43  ;;  %s1752_s30 = sshll.u32 %s2382_s2, 4  ;;  %s1753_s30 = int_to_ptr.vmem [resolvable:$true] %s1752_s30 }
  0xa0   :  { %s2352_s4 = scalar_lea.vmem %s1753_s30, 32  ;;  %p2357_p9 = scmp.lt.s32.totalorder %s1753_s30, %s1753_s30 }
  0xa1   :  { %2004 = vmatpush3.bf16.msra.mxu1 %v2254_v41  ;;  %v353_v22 = vrot.slane %v340_v39, %v352_v18  ;;  %p2353_p8 = scmp.ne.s32.totalorder %s1753_s30, %s2352_s4  ;;  %p2358_p10 = scmp.lt.s32.totalorder %s2352_s4, %s2352_s4 }
  0xa2   :  { %1511 = vmatpush1.bf16.msra.mxu0 %v2250_v40  ;;  %2005 = vmatprep.subr.bf16.mxu1 %v2258_v44 }
  0xa3   :  { %1512 = vmatprep.subr.bf16.mxu0 %v2257_v42  ;;  %p2359_p11 = por %p2358_p10, %p2357_p9 }
  0xa5   :  { %2006 = vmatpush3.bf16.msra.mxu1 %v2259_v46  ;;  %p2360_p12 = pnand %p2359_p11, %p2353_p8 }
  0xa6   :  { %1513 = vmatpush1.bf16.msra.mxu0 %v2255_v45  ;;  %2007 = vmatprep.subr.bf16.mxu1 %v2263_v48 }
  0xa7   :  { %1514 = vmatprep.subr.bf16.mxu0 %v2262_v47 }
  0xa9   :  { %2008 = vmatpush3.bf16.msra.mxu1 %v2264_v51 }
  0xaa   :  { %1515 = vmatpush1.bf16.msra.mxu0 %v2260_v50  ;;  %2009 = vmatprep.subr.bf16.mxu1 %v2268_v53 }
  0xab   :  { %1516 = vmatprep.subr.bf16.mxu0 %v2267_v52 }
  0xad   :  { %2010 = vmatpush3.bf16.msra.mxu1 %v2269_v55  ;;  %v344_v55 = vsub.s32 0, %v2415_v43 }
  0xae   :  { %1517 = vmatpush1.bf16.msra.mxu0 %v2265_v54  ;;  %2011 = vmatprep.subr.bf16.mxu1 %v2273_v57 }
  0xaf   :  { %1518 = vmatprep.subr.bf16.mxu0 %v2272_v56  ;;  %v348_v56 = vsub.s32 1, %v2415_v43  ;;  %v345_v57 = vrot.slane %v340_v39, %v344_v55 }
  0xb1   :  { %2012 = vmatpush3.bf16.msra.mxu1 %v2274_v59 }
  0xb2   :  { %1519 = vmatpush1.bf16.msra.mxu0 %v2270_v58  ;;  %2019 = vmatprep.subr.bf16.mxu1 %v2278_v61  ;;  %v349_v58 = vrot.slane %v340_v39, %v348_v56 }
  0xb3   :  { %1520 = vmatprep.subr.bf16.mxu0 %v2277_v60 }
  0xb4   :  { %1658 = vmatmul.mubr.bf16.vlgmr.msra.gmra.mrb[12].mxu1 %v2454_v29  ;;  %v2314_v29 = vld [vmem:[#allocation2 + $0x530] ss:$12 sps:$4 sm:$0xff]  }
  0xb5   :  { %2020 = vmatpush3.bf16.msra.mxu1 %v2279_v63  ;;  %1697 = vmatprep.mubr.bf16.mxu1 %v2456_v33 }
  0xb6   :  { %1521 = vmatpush1.bf16.msra.mxu0 %v2275_v62  ;;  %2021 = vmatprep.subr.bf16.mxu1 %v2283_v1 }
  0xb7   :  { %1522 = vmatprep.subr.bf16.mxu0 %v2282_v0 }
  0xb9   :  { %2022 = vmatpush3.bf16.msra.mxu1 %v2284_v4 }
  0xba   :  { %1523 = vmatpush1.bf16.msra.mxu0 %v2280_v2  ;;  %2023 = vmatprep.subr.bf16.mxu1 %v2288_v6 }
  0xbb   :  { %1524 = vmatprep.subr.bf16.mxu0 %v2287_v5 }
  0xbd   :  { %2024 = vmatpush3.bf16.msra.mxu1 %v2289_v8 }
  0xbe   :  { %1525 = vmatpush1.bf16.msra.mxu0 %v2285_v7  ;;  %2025 = vmatprep.subr.bf16.mxu1 %v2293_v3 }
  0xbf   :  { %1526 = vmatprep.subr.bf16.mxu0 %v2292_v9 }
  0xc1   :  { %2026 = vmatpush3.bf16.msra.mxu1 %v2294_v11 }
  0xc2   :  { %1527 = vmatpush1.bf16.msra.mxu0 %v2290_v10  ;;  %2027 = vmatprep.subr.bf16.mxu1 %v2298_v13 }
  0xc3   :  { %1528 = vmatprep.subr.bf16.mxu0 %v2297_v12 }
  0xc5   :  { %2028 = vmatpush3.bf16.msra.mxu1 %v2299_v15 }
  0xc6   :  { %1529 = vmatpush1.bf16.msra.mxu0 %v2295_v14  ;;  %2029 = vmatprep.subr.bf16.mxu1 %v2303_v17 }
  0xc7   :  { %1530 = vmatprep.subr.bf16.mxu0 %v2302_v16 }
  0xc9   :  { %2030 = vmatpush3.bf16.msra.mxu1 %v2304_v20 }
  0xca   :  { %1531 = vmatpush1.bf16.msra.mxu0 %v2300_v19  ;;  %2031 = vmatprep.subr.bf16.mxu1 %v2308_v23 }
  0xcb   :  { %1532 = vmatprep.subr.bf16.mxu0 %v2307_v21 }
  0xcd   :  { %2032 = vmatpush3.bf16.msra.mxu1 %v2309_v25 }
  0xce   :  { %1533 = vmatpush1.bf16.msra.mxu0 %v2305_v24  ;;  %2033 = vmatprep.subr.bf16.mxu1 %v2313_v27 }
  0xcf   :  { %1534 = vmatprep.subr.bf16.mxu0 %v2312_v26 }
  0xd1   :  { %2034 = vmatpush3.bf16.msra.mxu1 %v2314_v29 }
  0xd2   :  { %1535 = vmatpush1.bf16.msra.mxu0 %v2310_v28 }
  0xd4   :  { %1698 = vmatmul.mubr.bf16.vlgmr.msra.gmra.mrb[16].mxu1 %v82_v30 }
  0xd5   :  { %1537 = vmatmul.mubr.bf16.vlgmr.msra.gmra.mrb[0].mxu0 %v82_v30 }
 0x127   :  { %v1415_v49 = vpop.f32.mrb[0].mxu1 }
 0x128   :  { %v1417_v31 = vpop.f32.mrb[1].mxu1  ;;  %v1416_v59 = vadd.f32 %v1415_v49, %v345_v57 }
 0x129   :  { %v1419_v32 = vpop.f32.mrb[2].mxu1  ;;  %v1418_v60 = vadd.f32 %v1417_v31, %v349_v58 }
 0x12a   :  { %v1420_v33 = vpop.f32.mrb[3].mxu1 }
 0x147   :  { %v1969_v34 = vpop.f32.mrb[4].mxu1 }
 0x148   :  { %v1970_v35 = vpop.f32.mrb[5].mxu1 }
 0x149   :  { %v1971_v36 = vadd.f32 %v1970_v35, %v1969_v34  ;;  %v1972_v37 = vpop.f32.mrb[6].mxu1 }
 0x14a   :  { %v1973_v38 = vpop.f32.mrb[7].mxu1 }
 0x14b   :  { %v1580_v42 = vadd.f32 %v1971_v36, %v353_v22 }
 0x167   :  { %v1991_v40 = vpop.f32.mrb[8].mxu1 }
 0x168   :  { %v1992_v41 = vpop.f32.mrb[9].mxu1 }
 0x169   :  { %v1993_v44 = vadd.f32 %v1992_v41, %v1991_v40  ;;  %v1994_v45 = vpop.f32.mrb[10].mxu1 }
 0x16a   :  { %v1995_v46 = vpop.f32.mrb[11].mxu1 }
 0x16b   :  { %v1620_v47 = vadd.f32 %v1993_v44, %v1580_v42 }
 0x187   :  { %v2013_v48 = vpop.f32.mrb[12].mxu1 }
 0x188   :  { %v2014_v50 = vpop.f32.mrb[13].mxu1 }
 0x189   :  { %v2015_v51 = vadd.f32 %v2014_v50, %v2013_v48  ;;  %v2016_v52 = vpop.f32.mrb[14].mxu1 }
 0x18a   :  { %v2017_v53 = vpop.f32.mrb[15].mxu1 }
 0x18b   :  { %v1660_v54 = vadd.f32 %v2015_v51, %v1620_v47 }
 0x1a7   :  { %v2035_v62 = vpop.f32.mrb[16].mxu1 }
 0x1a8   :  { %v1538_v61 = vpop.f32.mrb[0].mxu0  ;;  %v2036_v1 = vpop.f32.mrb[17].mxu1 }
 0x1a9   :  { %v2042_v63 = vadd.f32 %v1538_v61, %v1416_v59  ;;  %v1540_v0 = vpop.f32.mrb[1].mxu0  ;;  %v2037_v4 = vadd.f32 %v2036_v1, %v2035_v62  ;;  %v2038_v6 = vpop.f32.mrb[18].mxu1 }
 0x1aa   :  { %v2044_v2 = vadd.f32 %v1540_v0, %v1418_v60  ;;  %v1542_v5 = vpop.f32.mrb[2].mxu0  ;;  %v2039_v8 = vpop.f32.mrb[19].mxu1 }
 0x1ab   :  { %v1543_v7 = vpop.f32.mrb[3].mxu0  ;;  %v1706_v9 = vsel %vm1705_vm0, %v2042_v63, -inf  ;;  %v1700_v43 = vadd.f32 %v2037_v4, %v1660_v54 }
 0x1ac   :  { %1707 = vmax.xlane.f32.xlu0 %v1706_v9  ;;  %v1717_v10 = vsel %vm1705_vm0, %v2044_v2, -inf }
 0x1ad   :  { %v1729_v3 = vsel %vm1705_vm0, %v1700_v43, -inf }
 0x1ae   :  { %1730 = vmax.xlane.f32.xlu1 %v1729_v3 }
 0x1b0   :  { %1718 = vmax.xlane.f32.xlu0 %v1717_v10 }
 0x239   :  { %v1708_v11 = vpop.xlane.xlu0 %1707 }
 0x23a   :  { %v1709_v12 = vsub.f32 %v2042_v63, %v1708_v11 }
 0x23b   :  { %v1731_v14 = vpop.xlane.xlu1 %1730 }
 0x23c   :  { %v1710_v13 = vmul.f32 1.442695, %v1709_v12  ;;  %v1732_v15 = vsub.f32 %v1700_v43, %v1731_v14 }
 0x23d   :  { %v1719_v16 = vpop.xlane.xlu0 %1718 }
 0x23e   :  { %2316 = vpow2.f32 %v1710_v13  ;;  %v1720_v17 = vsub.f32 %v2044_v2, %v1719_v16  ;;  %v1733_v19 = vmul.f32 1.442695, %v1732_v15 }
 0x240   :  { %v1721_v20 = vmul.f32 1.442695, %v1720_v17  ;;  %2318 = vpow2.f32 %v1733_v19 }
 0x242   :  { %2320 = vpow2.f32 %v1721_v20 }
 0x248   :  { %v2317_v21 = vpop.eup %2316 }
 0x249   :  { %v1712_v23 = vsel %vm1705_vm0, %v2317_v21, 0.0 }
 0x24a   :  { %1713 = vadd.xlane.f32.xlu1 %v1712_v23  ;;  %v2319_v24 = vpop.eup %2318 }
 0x24b   :  { %v1735_v26 = vsel %vm1705_vm0, %v2319_v24, 0.0 }
 0x24c   :  { %v2321_v25 = vpop.eup %2320 }
 0x24d   :  { %v1723_v27 = vsel %vm1705_vm0, %v2321_v25, 0.0 }
 0x24e   :  { %1736 = vadd.xlane.f32.xlu1 %v1735_v26  ;;  %1724 = vadd.xlane.f32.xlu0 %v1723_v27 }
 0x2d7   :  { %v1714_v28 = vpop.xlane.xlu1 %1713 }
 0x2d8   :  { %2322 = vrcp.f32 %v1714_v28 }
 0x2db   :  { %v1737_v29 = vpop.xlane.xlu1 %1736  ;;  %v1725_v30 = vpop.xlane.xlu0 %1724 }
 0x2dc   :  { %2324 = vrcp.f32 %v1737_v29 }
 0x2dd   :  { %2326 = vrcp.f32 %v1725_v30 }
 0x2e2   :  { %v2323_v49 = vpop.eup %2322 }
 0x2e3   :  { %v1716_v33 = vmul.f32 %v2323_v49, %v2317_v21 }
 0x2e6   :  { %v2325_v31 = vpop.eup %2324 }
 0x2e7   :  { %v2327_v32 = vpop.eup %2326  ;;  %v1739_v36 = vmul.f32 %v2325_v31, %v2319_v24 }
 0x2e8   :  { %v1727_v34 = vmul.f32 %v2327_v32, %v2321_v25 }
 0x2ea   :  { %v1728_v35 = vadd.f32 %v1727_v34, %v1716_v33 }
 0x2ec   :  { %v1740_v37 = vadd.f32 %v1739_v36, %v1728_v35 }
 0x2ee   :  { %v1741_v38 = vmul.f32 0.33333334, %v1740_v37 }
 0x2f0   :  { %v1742_v18 = vmax.f32 %v1741_v38, 1.1754944e-38 }
 0x2f2   :  { %2328 = vlog2.f32 %v1742_v18 }
 0x2fc   :  { %v2329_v39 = vpop.eup %2328 }
 0x2fd   :  { %v1744_v22 = vmul.f32 0.6931472, %v2329_v39 }
 0x2ff   :  { %1745 = vst [vmem:[#allocation5] sm:$0x3] %v1744_v22 }
 0x300   :  { %2363 = shalt.err (!%p2360_p12)
}
 0x301   :  { %s2364_s7 = scalar_lea.hbm %s2493_s3, 32 }
 0x302   :  { %p2365_p13 = scmp.ne.s32.totalorder %s2493_s3, %s2364_s7  ;;  %p2368_p0 = scmp.lt.u32.totalorder %s2364_s7, %s2493_s3 }
 0x304   :  { %p2370_p1 = pnand %p2368_p0, %p2365_p13 }
 0x306   :  { %2373 = shalt.err (!%p2370_p1)
}
 0x307   :  { %1755 = dma.vmem_to_hbm [thread:$0]  %s1753_s30, 32, %s2493_s3, [#allocation4]  }
 0x308   :  { %2376 = dma.done.wait [#allocation4], 32  }
 0x309   :  { %2377 = vsyncadd [#allocation4], 4294967264 }
 0x30a   :  { %1759 = vsyncpa [#allocation3], 1 }
 0x30b   :  { %1760 = vsyncpa [#allocation4], 1 }

</bundles_post_ra>
